<compile_context>
chip_gen: v7x
topology: tpu7x:2x2x1
jax: 0.10.0
libtpu: 0.0.40
codegen_flags: <defaults>
</compile_context>

<pallas_src>
import math

import jax
import jax.numpy as jnp
from jax import lax
from jax.experimental import pallas as pl
from jax.experimental.pallas import tpu as pltpu

# fixed temporal table sizes (embed_type='fixed', freq='h')
_HOUR, _WEEKDAY, _DAY, _MONTH = 24, 7, 32, 13
_TAB_ROWS = 128  # 24+7+32+13 = 76 rows, padded to a lane-friendly 128
# offsets folded into the mark columns [month, day, weekday, hour] (wrapper-side)
_MARK_OFFSETS = (_HOUR + _WEEKDAY + _DAY, _HOUR + _WEEKDAY, _HOUR, 0)


def _round_up(n, m):
    return ((n + m - 1) // m) * m


# ----------------------------- parameter construction -----------------------------

def sinusoid_table(n, d_model):
    """Fixed sin/cos table, identical to PyTorch PositionalEmbedding / FixedEmbedding."""
    position = jnp.arange(n, dtype=jnp.float32)[:, None]
    div_term = jnp.exp(
        jnp.arange(0, d_model, 2, dtype=jnp.float32) * -(math.log(10000.0) / d_model)
    )
    tab = jnp.zeros((n, d_model), dtype=jnp.float32)
    tab = tab.at[:, 0::2].set(jnp.sin(position * div_term))
    tab = tab.at[:, 1::2].set(jnp.cos(position * div_term))
    return tab


def make_params(key, c_in, d_model, max_len=5000):
    # TokenEmbedding: Conv1d(c_in, d_model, k=3, bias=False), kaiming_normal fan_in (leaky_relu).
    fan_in = c_in * 3
    std = math.sqrt(2.0) / math.sqrt(fan_in)
    w_conv = jax.random.normal(key, (d_model, c_in, 3), dtype=jnp.float32) * std
    return {
        "w_conv": w_conv,                        # (d_model, c_in, 3)
        "pe": sinusoid_table(max_len, d_model),  # positional table
        "hour": sinusoid_table(_HOUR, d_model),
        "weekday": sinusoid_table(_WEEKDAY, d_model),
        "day": sinusoid_table(_DAY, d_model),
        "month": sinusoid_table(_MONTH, d_model),
    }


# ----------------------------------- Pallas kernel ---------------------------------

def data_embedding_kernel(xc_ref, mark_ref, w_ref, tab_ref, pe_ref, o_ref):
    # xc_ref:   (tile_m, 3*c_in)   [x[l-1] | x[l] | x[l+1]] column groups (matmul dtype)
    # mark_ref: (tile_m, 4) int32  offset-folded [month+63, day+31, weekday+24, hour]
    # w_ref:    (3*c_in, d_pad)    fused circular-conv taps (matmul dtype)
    # tab_ref:  (128, d_pad)       hour|weekday|day|month sinusoid rows, zero padded
    # pe_ref:   (L_pad, d_pad)     positional table (resident across the whole grid, f32)
    # o_ref:    (tile_m, d_pad)
    li = pl.program_id(1)
    tile_m = o_ref.shape[0]

    # circular Conv1d(k=3, padding=1, padding_mode='circular') fused into one MXU matmul
    conv = jnp.dot(xc_ref[...], w_ref[...], preferred_element_type=jnp.float32)

    # fixed temporal embedding: multi-hot (tile_m,128) @ (128,d_pad) MXU matmul.
    # Offsets are pre-folded, so nominal-range marks land in disjoint row ranges
    # (hour [0,24), weekday [24,31), day [31,63), month [63,76)).
    mk = mark_ref[...]
    pos = lax.broadcasted_iota(jnp.int32, (tile_m, tab_ref.shape[0]), 1)
    hot = (
        (pos == mk[:, 0:1]) | (pos == mk[:, 1:2])
        | (pos == mk[:, 2:3]) | (pos == mk[:, 3:4])
    ).astype(tab_ref.dtype)
    temb = jnp.dot(hot, tab_ref[...], preferred_element_type=jnp.float32)

    s = pl.multiple_of(li * tile_m, tile_m)
    o_ref[...] = (conv + temb + pe_ref[pl.ds(s, tile_m), :]).astype(o_ref.dtype)


# ------------------------------------- wrapper --------------------------------------

def _choose_block_m(L, target=512):
    """L tile: ~L/ceil(L/target), rounded up to a multiple of 8 (L is padded to a multiple)."""
    nb = pl.cdiv(L, target)
    return _round_up(pl.cdiv(L, nb), 8)


def data_embedding(x, x_mark, params, *, block_m=None,
                   matmul_dtype=jnp.float32, out_dtype=jnp.float32):
    """DataEmbedding forward (embed_type='fixed', freq='h'; eval mode: dropout is identity).

    matmul_dtype=jnp.bfloat16: cast MXU operands only (conv input/weights, multi-hot, temporal
    table); accumulation and all elementwise adds stay f32 (safe on v5e/v6e/v7x MXUs).
    out_dtype=jnp.bfloat16: halve the dominant (B,L,d_model) HBM write if downstream accepts it.
    """
    B, L, c_in = x.shape
    d_model = params["w_conv"].shape[0]
    d_pad = _round_up(d_model, 128)          # lane-dense output stores (unmasked vst)

    if block_m is None:
        block_m = _choose_block_m(L)
    L_pad = _round_up(L, block_m)
    num_m = L_pad // block_m

    # fused circular-shift input (B, L_pad, 3*c_in): column group k holds x[l + k - 1] (circular)
    x_cat = jnp.concatenate(
        [jnp.roll(x, 1, axis=1), x, jnp.roll(x, -1, axis=1)], axis=-1
    ).astype(matmul_dtype)
    x_cat = jnp.pad(x_cat, ((0, 0), (0, L_pad - L), (0, 0)))

    # conv taps: (d_model, c_in, 3) -> (3*c_in, d_pad); row k*c_in + c multiplies x[l+k-1][c]
    w = jnp.transpose(params["w_conv"], (2, 1, 0)).reshape(3 * c_in, d_model)
    w = jnp.pad(w, ((0, 0), (0, d_pad - d_model))).astype(matmul_dtype)

    # combined fixed temporal table (tiny, resident in VMEM)
    tab = jnp.concatenate(
        [params["hour"], params["weekday"], params["day"], params["month"]], axis=0)
    tab = jnp.pad(tab, ((0, _TAB_ROWS - tab.shape[0]), (0, d_pad - d_model))).astype(matmul_dtype)

    # positional table, resident (constant index_map -> fetched once), f32
    pe = jnp.pad(params["pe"][:L], ((0, L_pad - L), (0, d_pad - d_model)))

    # marks with sub-table offsets folded in; columns [month, day, weekday, hour]
    offs = jnp.asarray(_MARK_OFFSETS, dtype=jnp.int32)
    mark = x_mark[..., :4].astype(jnp.int32) + offs
    mark = jnp.pad(mark, ((0, 0), (0, L_pad - L), (0, 0)))

    out = pl.pallas_call(
        data_embedding_kernel,
        out_shape=jax.ShapeDtypeStruct((B, L_pad, d_pad), out_dtype),
        grid_spec=pltpu.PrefetchScalarGridSpec(
            num_scalar_prefetch=0,
            grid=(B, num_m),
            in_specs=[
                pl.BlockSpec((None, block_m, 3 * c_in), lambda b, l: (b, l, 0)),  # x_cat tile
                pl.BlockSpec((None, block_m, 4), lambda b, l: (b, l, 0)),         # mark tile
                pl.BlockSpec((3 * c_in, d_pad), lambda b, l: (0, 0)),              # conv weights
                pl.BlockSpec((_TAB_ROWS, d_pad), lambda b, l: (0, 0)),             # temporal table
                pl.BlockSpec((L_pad, d_pad), lambda b, l: (0, 0)),                 # positional table
            ],
            out_specs=pl.BlockSpec((None, block_m, d_pad), lambda b, l: (b, l, 0)),
        ),
        compiler_params=pltpu.CompilerParams(
            # no cross-iteration state: both axes shard freely across TensorCores (v7x dual-TC)
            dimension_semantics=("parallel", "parallel"),
            vmem_limit_bytes=32 * 1024 * 1024,
        ),
    )(x_cat, mark, w, tab, pe)

    # TODO(synk): nn.Dropout(p=0.1) is stochastic only in training mode; eval forward is identity.
    # TODO(synk): freq='t' (minute table) and embed_type='timeF' (Linear) paths not implemented.
    return out[:, :L, :d_model]


# ---------------------------------------- main --------------------------------------

if __name__ == "__main__":
    B, L, c_in, d_model = 2, 8, 4, 32

    key = jax.random.PRNGKey(0)
    k_w, k_x, k_m1, k_m2, k_m3, k_m4 = jax.random.split(key, 6)

    params = make_params(k_w, c_in, d_model)

    x = jax.random.normal(k_x, (B, L, c_in), dtype=jnp.float32)
    # x_mark columns: [month, day, weekday, hour] (freq='h', embed_type='fixed')
    x_mark = jnp.stack(
        [
            jax.random.randint(k_m1, (B, L), 0, _MONTH),
            jax.random.randint(k_m2, (B, L), 0, _DAY),
            jax.random.randint(k_m3, (B, L), 0, _WEEKDAY),
            jax.random.randint(k_m4, (B, L), 0, _HOUR),
        ],
        axis=-1,
    ).astype(jnp.float32)

    out = data_embedding(x, x_mark, params)
    out = jax.block_until_ready(out)

    # pure-JAX reference of the same forward math
    W = params["w_conv"]
    ref = (
        jnp.roll(x, 1, axis=1) @ W[:, :, 0].T
        + x @ W[:, :, 1].T
        + jnp.roll(x, -1, axis=1) @ W[:, :, 2].T
    )
    xm = x_mark.astype(jnp.int32)
    ref = ref + (
        params["hour"][xm[:, :, 3]]
        + params["weekday"][xm[:, :, 2]]
        + params["day"][xm[:, :, 1]]
        + params["month"][xm[:, :, 0]]
    )
    ref = ref + params["pe"][:L][None]

    assert out.shape == (B, L, d_model)
    assert bool(jnp.all(jnp.isfinite(out)))
    assert jnp.allclose(out, ref, atol=1e-4, rtol=1e-4), float(jnp.max(jnp.abs(out - ref)))

    # bf16-MXU path (v6e/v7x fast path; MXU-operands-only on v5e): looser tolerance
    out_bf16 = jax.block_until_ready(
        data_embedding(x, x_mark, params, matmul_dtype=jnp.bfloat16))
    assert bool(jnp.all(jnp.isfinite(out_bf16)))
    assert jnp.allclose(out_bf16, ref, atol=1e-1, rtol=1e-1), \
        float(jnp.max(jnp.abs(out_bf16 - ref)))

    print("KERNEL_OK")
</pallas_src>

<mosaic_0001>
module attributes {stable_mosaic.version = 11 : i64} {
  func.func @data_embedding_kernel(%arg0: i32, %arg1: i32, %arg2: memref<1x8x12xf32, #tpu.memory_space<vmem>>, %arg3: memref<1x8x4xi32, #tpu.memory_space<vmem>>, %arg4: memref<12x128xf32, #tpu.memory_space<vmem>>, %arg5: memref<128x128xf32, #tpu.memory_space<vmem>>, %arg6: memref<8x128xf32, #tpu.memory_space<vmem>>, %arg7: memref<1x8x128xf32, #tpu.memory_space<vmem>>) attributes {dimension_semantics = [#tpu.dimension_semantics<parallel>, #tpu.dimension_semantics<parallel>], iteration_bounds = array<i64: 2, 1>, scalar_prefetch = 0 : i64, scratch_operands = 0 : i64, tpu.core_type = #tpu.core_type<tc>, window_params = [{transform_indices = @transform_0, window_bounds = array<i64: 1, 8, 12>}, {transform_indices = @transform_1, window_bounds = array<i64: 1, 8, 4>}, {pipeline_mode = #tpu.pipeline_mode<synchronous>, transform_indices = @transform_2, window_bounds = array<i64: 12, 128>}, {pipeline_mode = #tpu.pipeline_mode<synchronous>, transform_indices = @transform_3, window_bounds = array<i64: 128, 128>}, {pipeline_mode = #tpu.pipeline_mode<synchronous>, transform_indices = @transform_4, window_bounds = array<i64: 8, 128>}, {transform_indices = @transform_5, window_bounds = array<i64: 1, 8, 128>}]} {
    %c0 = arith.constant 0 : index
    %c0_0 = arith.constant 0 : index
    %c0_1 = arith.constant 0 : index
    %0 = vector.load %arg2[%c0, %c0_0, %c0_1] : memref<1x8x12xf32, #tpu.memory_space<vmem>>, vector<1x8x12xf32>
    %1 = vector.shape_cast %0 : vector<1x8x12xf32> to vector<8x12xf32>
    %c0_2 = arith.constant 0 : index
    %c0_3 = arith.constant 0 : index
    %2 = vector.load %arg4[%c0_2, %c0_3] : memref<12x128xf32, #tpu.memory_space<vmem>>, vector<12x128xf32>
    %cst = arith.constant dense<0.000000e+00> : vector<8x128xf32>
    %3 = tpu.matmul %1, %2, %cst {dimension_numbers = #tpu.dot_dimension_numbers<[1], [0], [0], [1], [0, 0, 1, 1], [], []>} : vector<8x12xf32>, vector<12x128xf32>, vector<8x128xf32> -> vector<8x128xf32>
    %c0_4 = arith.constant 0 : index
    %c0_5 = arith.constant 0 : index
    %c0_6 = arith.constant 0 : index
    %4 = vector.load %arg3[%c0_4, %c0_5, %c0_6] : memref<1x8x4xi32, #tpu.memory_space<vmem>>, vector<1x8x4xi32>
    %5 = vector.shape_cast %4 : vector<1x8x4xi32> to vector<8x4xi32>
    %6 = tpu.iota {dimensions = array<i32: 1>} : vector<8x128xi32>
    %7 = vector.extract_strided_slice %5 {offsets = [0, 0], sizes = [8, 1], strides = [1, 1]} : vector<8x4xi32> to vector<8x1xi32>
    %8 = vector.broadcast %7 : vector<8x1xi32> to vector<8x128xi32>
    %9 = arith.cmpi eq, %6, %8 : vector<8x128xi32>
    %10 = vector.extract_strided_slice %5 {offsets = [0, 1], sizes = [8, 1], strides = [1, 1]} : vector<8x4xi32> to vector<8x1xi32>
    %11 = vector.broadcast %10 : vector<8x1xi32> to vector<8x128xi32>
    %12 = arith.cmpi eq, %6, %11 : vector<8x128xi32>
    %13 = arith.ori %9, %12 : vector<8x128xi1>
    %14 = vector.extract_strided_slice %5 {offsets = [0, 2], sizes = [8, 1], strides = [1, 1]} : vector<8x4xi32> to vector<8x1xi32>
    %15 = vector.broadcast %14 : vector<8x1xi32> to vector<8x128xi32>
    %16 = arith.cmpi eq, %6, %15 : vector<8x128xi32>
    %17 = arith.ori %13, %16 : vector<8x128xi1>
    %18 = vector.extract_strided_slice %5 {offsets = [0, 3], sizes = [8, 1], strides = [1, 1]} : vector<8x4xi32> to vector<8x1xi32>
    %19 = vector.broadcast %18 : vector<8x1xi32> to vector<8x128xi32>
    %20 = arith.cmpi eq, %6, %19 : vector<8x128xi32>
    %21 = arith.ori %17, %20 : vector<8x128xi1>
    %22 = arith.extui %21 : vector<8x128xi1> to vector<8x128xi32>
    %23 = arith.sitofp %22 : vector<8x128xi32> to vector<8x128xf32>
    %c0_7 = arith.constant 0 : index
    %c0_8 = arith.constant 0 : index
    %24 = vector.load %arg5[%c0_7, %c0_8] : memref<128x128xf32, #tpu.memory_space<vmem>>, vector<128x128xf32>
    %cst_9 = arith.constant dense<0.000000e+00> : vector<8x128xf32>
    %25 = tpu.matmul %23, %24, %cst_9 {dimension_numbers = #tpu.dot_dimension_numbers<[1], [0], [0], [1], [0, 0, 1, 1], [], []>} : vector<8x128xf32>, vector<128x128xf32>, vector<8x128xf32> -> vector<8x128xf32>
    %c8_i32 = arith.constant 8 : i32
    %26 = arith.muli %arg1, %c8_i32 : i32
    %27 = tpu.assume_multiple %26, 8 : i32
    %28 = arith.addf %3, %25 : vector<8x128xf32>
    %29 = arith.index_cast %27 : i32 to index
    %c0_10 = arith.constant 0 : index
    %30 = vector.load %arg6[%29, %c0_10] : memref<8x128xf32, #tpu.memory_space<vmem>>, vector<8x128xf32>
    %31 = arith.addf %28, %30 : vector<8x128xf32>
    %c0_11 = arith.constant 0 : index
    %c0_12 = arith.constant 0 : index
    %c0_13 = arith.constant 0 : index
    %32 = vector.load %arg7[%c0_11, %c0_12, %c0_13] : memref<1x8x128xf32, #tpu.memory_space<vmem>>, vector<1x8x128xf32>
    %33 = vector.shape_cast %32 : vector<1x8x128xf32> to vector<8x128xf32>
    %34 = vector.shape_cast %31 : vector<8x128xf32> to vector<1x8x128xf32>
    tpu.vector_store %arg7[%c0_11, %c0_12, %c0_13], %34 {strides = array<i32>} : memref<1x8x128xf32, #tpu.memory_space<vmem>>, vector<1x8x128xf32>,
    return
  }
  func.func @transform_0(%arg0: i32, %arg1: i32) -> (i32, i32, i32) {
    %c0_i32 = arith.constant 0 : i32
    %c0_i32_0 = arith.constant 0 : i32
    return %arg0, %arg1, %c0_i32 : i32, i32, i32
  }
  func.func @transform_1(%arg0: i32, %arg1: i32) -> (i32, i32, i32) {
    %c0_i32 = arith.constant 0 : i32
    %c0_i32_0 = arith.constant 0 : i32
    return %arg0, %arg1, %c0_i32 : i32, i32, i32
  }
  func.func @transform_2(%arg0: i32, %arg1: i32) -> (i32, i32) {
    %c0_i32 = arith.constant 0 : i32
    %c0_i32_0 = arith.constant 0 : i32
    %c0_i32_1 = arith.constant 0 : i32
    return %c0_i32, %c0_i32_0 : i32, i32
  }
  func.func @transform_3(%arg0: i32, %arg1: i32) -> (i32, i32) {
    %c0_i32 = arith.constant 0 : i32
    %c0_i32_0 = arith.constant 0 : i32
    %c0_i32_1 = arith.constant 0 : i32
    return %c0_i32, %c0_i32_0 : i32, i32
  }
  func.func @transform_4(%arg0: i32, %arg1: i32) -> (i32, i32) {
    %c0_i32 = arith.constant 0 : i32
    %c0_i32_0 = arith.constant 0 : i32
    %c0_i32_1 = arith.constant 0 : i32
    return %c0_i32, %c0_i32_0 : i32, i32
  }
  func.func @transform_5(%arg0: i32, %arg1: i32) -> (i32, i32, i32) {
    %c0_i32 = arith.constant 0 : i32
    %c0_i32_0 = arith.constant 0 : i32
    return %arg0, %arg1, %c0_i32 : i32, i32, i32
  }
}

</mosaic_0001>

<bundles_post_ra>
// kernel: tpu_custom_call.1
= control target key start
LH: loop header
LB: loop body
LE: loop exit
PB: predicated region body
PF: predicated region fallthrough
CT: control target
= control target key end

     0   :  { %10 = vsyncpa [#allocation3], 0  ;;  %s1223_s0 = inlined_call_operand.vmem [shape: f32[2,8,12], index: 0, kind: input, shape index: {}]   ;;  %s1224_s1 = inlined_call_operand.vmem [shape: s32[2,8,4], index: 1, kind: input, shape index: {}]   ;;  %s1225_s2 = inlined_call_operand.hbm [shape: f32[12,128], index: 2, kind: input, shape index: {}]   ;;  %s1226_s3 = inlined_call_operand.hbm [shape: f32[128,128], index: 3, kind: input, shape index: {}]   ;;  %s1227_s4 = inlined_call_operand.vmem [shape: f32[8,128], index: 4, kind: input, shape index: {}]   ;;  %s1228_s5 = inlined_call_operand.hbm [shape: f32[2,8,128], index: 5, kind: output, shape index: {}]  }
   0x1   :  { %11 = vsyncpa [#allocation6], 0 }
   0x2   :  { %12 = vsyncpa [#allocation4], 0 }
   0x3   :  { %14 = vsyncpa [#allocation4 + $0x1], 0  ;;  %s1014_s18 = smov 0   ;;  %s1016_s19 = smov 0  }
   0x4   :  { %s1018_s20 = smov 0   ;;  %s1020_s21 = smov 0  }
   0x5   :  { %s1022_s22 = smov 0   ;;  %s1024_s23 = smov 0  }
   0x6 LB: > { %s624_s24 = sadd.s32 4294967295, %s968_s23   ;;  %s625_s25 = sadd.s32 4294967294, %s968_s23   ;;  %s968_s23 = sphi %s1024_s23, %s20_s23   ;;  %s964_s22 = sphi %s1022_s22, %s1249_s22   ;;  %s960_s21 = sphi %s1020_s21, %s1248_s21   ;;  %s956_s20 = sphi %s1018_s20, %s1247_s20   ;;  %s952_s19 = sphi %s1016_s19, %s1246_s19   ;;  %s948_s18 = sphi %s1014_s18, %s1245_s18  }
   0x7   : > { %s32_s26 = sadd.s32 1, %s964_s22  ;;  %s160_s27 = sadd.s32 1, %s956_s20 }
   0x8   : > { %p34_p0 = scmp.ge.s32.totalorder %s32_s26, 2  ;;  %p170_p1 = scmp.ne.s32.totalorder %s956_s20, %s952_s19 }
   0x9   : > { %p171_p2 = scmp.eq.s32.totalorder %s624_s24, 1  ;;  %p176_p3 = scmp.ne.s32.totalorder %s952_s19, %s948_s18 }
   0xa   : > { %s1251_s26 = smov (%p34_p0, %s32_s26), 0  ;;  %p177_p5 = scmp.eq.s32.totalorder %s625_s25, 1 }
   0xb   : > { %1234 = sst [smem:[#allocation11_spill]] %s1251_s26  ;;  %p1054_p4 = por %p171_p2, %p170_p1 }
   0xc   : > { %s155_s29 = ssub.s32 %s964_s22, %s1251_s26  ;;  %p626_p6 = scmp.ge.s32.totalorder %s968_s23, 1 }
   0xd   : > { %s1235_s28 = scalar_select %p1054_p4, 1, 0 }
   0xe   : > { %p158_p7 = scmp.eq.s32.totalorder %s155_s29, 0  ;;  %p1061_p8 = por %p177_p5, %p176_p3 }
   0xf   : > { %p184_p9 = scmp.lt.s32.totalorder %s968_s23, 3  ;;  %p1073_p11 = scmp.eq.s32.totalorder %s624_s24, 0 }
  0x10   : > { %s1236_s30 = scalar_select %p1061_p8, 1, 0 }
  0x11   : > { %s1067_s6 = scalar_select %p158_p7, %s956_s20, %s160_s27  }
  0x12   : > { %p1069_p10 = pnand %p626_p6, %p184_p9  ;;  %s970_s9 = smov [#allocation2]  }
  0x13   : > { %s1238_s8 = scalar_select %p1073_p11, 1, 0 }
  0x14   : > { %s1237_s7 = scalar_select %p1069_p10, 1, 0 }
  0x15   : > { %p744_p12 = pneg %p1069_p10  ;;  %s196_s10 = sshll.u32 %s970_s9, 4  ;;  %s197_s10 = int_to_ptr.vmem [resolvable:$true] %s196_s10 }
  0x16   : > { %s971_s12 = smov [#allocation5]   ;;  %s826_s16 = scalar_lea.hbm %s1225_s2, 256 }
  0x17   : > { %p1081_p13 = pnand %p1073_p11, %p744_p12  ;;  %s209_s13 = sshll.u32 %s971_s12, 4  ;;  %s1085_s13 = int_to_ptr.vmem [resolvable:$true] %s209_s13 }
  0x18   : > { %p827_p0 = scmp.ne.s32.totalorder %s1225_s2, %s826_s16  ;;  %p833_p5 = scmp.lt.u32.totalorder %s826_s16, %s1225_s2 }
  0x19   : > { %p828_p1 = pneg %p1081_p13 }
  0x1b   : > { %p829_p2 = pnand %p828_p1, %p827_p0 }
  0x1d   : > { %p830_p3 = pneg %p829_p2 }
  0x1f   : > { %p835_p6 = pnand %p833_p5, %p830_p3 }
  0x21   : > { %838 = shalt.err (!%p835_p6)
}
  0x22   : > { %s839_s29 = scalar_lea.vmem %s197_s10, 256  ;;  %p847_p8 = scmp.lt.s32.totalorder %s197_s10, %s197_s10 }
  0x23   : > { %p840_p7 = scmp.ne.s32.totalorder %s197_s10, %s839_s29  ;;  %p848_p4 = scmp.lt.s32.totalorder %s839_s29, %s839_s29 }
  0x25   : > { %p842_p9 = pnand %p840_p7, %p828_p1  ;;  %p849_p11 = por %p848_p4, %p847_p8 }
  0x27   : > { %p843_p12 = pneg %p842_p9 }
  0x29   : > { %p850_p10 = pnand %p849_p11, %p843_p12 }
  0x2b   : > { %853 = shalt.err (!%p850_p10)
}
  0x2c   : > { %s972_s9 = smov 128   ;;  %s973_s12 = smov 8  }
  0x2d   : > { %747 = dma.hbm_to_vmem [thread:$0]  (!%p1081_p13), %s1225_s2, 256, %s197_s10, [#allocation3], %s972_s9, %s972_s9, %s973_s12  }
  0x2e   : > { %s854_s24 = scalar_lea.hbm %s1226_s3, 2048 }
  0x2f   : > { %p855_p0 = scmp.ne.s32.totalorder %s1226_s3, %s854_s24  ;;  %p861_p10 = scmp.lt.u32.totalorder %s854_s24, %s1226_s3 }
  0x31   : > { %p857_p4 = pnand %p855_p0, %p828_p1 }
  0x33   : > { %p858_p8 = pneg %p857_p4 }
  0x35   : > { %p863_p11 = pnand %p861_p10, %p858_p8 }
  0x37   : > { %866 = shalt.err (!%p863_p11)
}
  0x38   : > { %s867_s10 = scalar_lea.vmem %s1085_s13, 2048  ;;  %p875_p6 = scmp.lt.s32.totalorder %s1085_s13, %s1085_s13 }
  0x39   : > { %p868_p2 = scmp.ne.s32.totalorder %s1085_s13, %s867_s10  ;;  %p876_p7 = scmp.lt.s32.totalorder %s867_s10, %s867_s10 }
  0x3b   : > { %p870_p3 = pnand %p868_p2, %p828_p1  ;;  %p877_p9 = por %p876_p7, %p875_p6 }
  0x3d   : > { %p871_p5 = pneg %p870_p3 }
  0x3f   : > { %p878_p12 = pnand %p877_p9, %p871_p5 }
  0x41   : > { %881 = shalt.err (!%p878_p12)
}
  0x42   : > { %750 = dma.hbm_to_vmem [thread:$0]  (!%p1081_p13), %s1226_s3, 2048, %s1085_s13, [#allocation6], %s972_s9, %s972_s9, %s973_s12  }
  0x43   : > { %p1240_p0 = scmp.ne.s32.totalorder %s1237_s7, 0 }
  0x44   : > { %p1241_p4 = scmp.ne.s32.totalorder (!%p1240_p0), %s1238_s8, 0 }
  0x45   : > { %248 = sbr.rel (%p1240_p0) target bundleno = 453 (0x1c5), region = 40 }
  0x4c   : > { %935 = dma.done.wait (%p1241_p4), [#allocation3], 256  }
  0x4d   : > { %937 = vsyncadd (%p1241_p4), [#allocation3], 4294967040 }
  0x4e   : > { %939 = dma.done.wait (%p1241_p4), [#allocation6], 2048  }
  0x4f   : > { %941 = vsyncadd (%p1241_p4), [#allocation6], 4294965248  ;;  %p289_p1 = scmp.lt.s32.totalorder %s960_s21, 1  ;;  %v974_v0 = vmov 0   ;;  %v975_v1 = vmov 2   ;;  %v976_v2 = vmov 0.0|0.0   ;;  %v307_v35 = vlaneseq }
  0x50   : > { %821 = vset.pattern.permute.xlu0 %v974_v0  ;;  %823 = vset.pattern.permute.xlu1 %v975_v1  ;;  %v330_v4 = vld [vmem:[#allocation5] sm:$0xff]  ;;  %v331_v5 = vld [vmem:[#allocation5 + $0x8] sm:$0xff]  ;;  %v332_v7 = vld [vmem:[#allocation5 + $0x10] sm:$0xff]  ;;  %vm421_vm0 = vcmask 1043456   ;;  %v977_v12 = vmov 1   ;;  %v978_v13 = vmov 3  }
  0x51   : > { %s1146_s7 = scalar_select %p289_p1, %s960_s21, 1  ;;  %706 = vmatprep.subr.bf16.mxu0 %v976_v2  ;;  %730 = vmatprep.subr.bf16.mxu1 %v976_v2  ;;  %v707_v6 = vpack.c.bf16 %v331_v5, %v330_v4  ;;  %v333_v8 = vld [vmem:[#allocation5 + $0x18] sm:$0xff]  ;;  %v334_v10 = vld [vmem:[#allocation5 + $0x20] sm:$0xff]  ;;  %v335_v11 = vld [vmem:[#allocation5 + $0x28] sm:$0xff]  ;;  %vm979_vm1 = vmmov 1   ;;  %vm417_vm3 = vcmask 97280  }
  0x52   : > { %v710_v9 = vpack.c.bf16 %v333_v8, %v332_v7  ;;  %v304_v14 = vld [vmem:[#allocation2] sm:$0xff]  ;;  %v305_v15 = vld [vmem:[#allocation2 + $0x8] sm:$0xf]  ;;  %vm732_vm2 = vmpackc.low %vm421_vm0, %vm979_vm1  ;;  %v713_v17 = vpack.c.bf16 %v335_v11, %v334_v10  ;;  %vm980_vm4 = vmmov 0   ;;  %v981_v21 = vmov 0.0   ;;  %s286_s17 = sand.u32 1, %s952_s19  }
  0x53   : > { %s634_s11 = sshll.u32 %s1146_s7, 3  ;;  %708 = vmatpush3.bf16.msra.mxu0 %v707_v6  ;;  %v731_v16 = vpack.c.bf16 %v305_v15, %v304_v14  ;;  %v336_v18 = vld [vmem:[#allocation5 + $0x30] sm:$0xff]  ;;  %v337_v19 = vld [vmem:[#allocation5 + $0x38] sm:$0xff]  ;;  %703 = vmatprep.mubr.msk.f32.mxu1 %vm980_vm4, %v981_v21  ;;  %v338_v23 = vld [vmem:[#allocation5 + $0x40] sm:$0xff]  ;;  %v308_v38 = vand.u32 127, %v307_v35  ;;  %v982_v41 = vmov 1.0  }
  0x54   : > { %s302_s9 = scalar_lea.vmem %s1224_s1, %s634_s11  ;;  %709 = vmatprep.subr.bf16.mxu0 %v976_v2  ;;  %s295_s16 = scalar_lea.vmem %s1223_s0, %s634_s11  ;;  %696 = vmatprep.mubr.msk.f32.mxu0 %vm980_vm4, %v981_v21  ;;  %v716_v22 = vpack.c.bf16 %v337_v19, %v336_v18  ;;  %v339_v24 = vld [vmem:[#allocation5 + $0x48] sm:$0xff]  ;;  %v340_v26 = vld [vmem:[#allocation5 + $0x50] sm:$0xff]  ;;  %v341_v27 = vld [vmem:[#allocation5 + $0x58] sm:$0xff] }
  0x55   : > { %v306_v3 = vld [vmem:[%s302_s9] sm:$0xff]  ;;  %733 = vmatpush3.bf16.msk.msra.mxu1 %vm732_vm2, %v731_v16  ;;  %v719_v25 = vpack.c.bf16 %v339_v24, %v338_v23  ;;  %v722_v28 = vpack.c.bf16 %v341_v27, %v340_v26  ;;  %v342_v29 = vld [vmem:[#allocation5 + $0x60] sm:$0xff]  ;;  %v343_v30 = vld [vmem:[#allocation5 + $0x68] sm:$0xff]  ;;  %s633_s24 = sshll.u32 %s286_s17, 3  ;;  %s641_s29 = sshll.u32 %s960_s21, 7 }
  0x56   : > { %310 = vperm.xlu0 %821, %v306_v3   ;;  %319 = vperm.xlu1 %823, %v306_v3   ;;  %v303_v20 = vld [vmem:[%s295_s16] sm:$0xff]  ;;  %v725_v31 = vpack.c.bf16 %v343_v30, %v342_v29  ;;  %v345_v33 = vld [vmem:[#allocation5 + $0x78] sm:$0xff]  ;;  %s288_s10 = scalar_lea.vmem [#allocation7], %s633_s24  ;;  %s1176_s11 = scalar_lea.hbm %s1228_s5, %s641_s29 }
  0x57   : > { %711 = vmatpush3.bf16.msra.mxu0 %v710_v9  ;;  %v344_v32 = vld [vmem:[#allocation5 + $0x70] sm:$0xff]  ;;  %s514_s26 = sshll.u32 %s288_s10, 4  ;;  %s500_s8 = scalar_lea.sflag [#allocation4], %s286_s17  ;;  %s1178_s26 = int_to_ptr.vmem [resolvable:$true] %s514_s26 }
  0x58   : > { %712 = vmatprep.subr.bf16.mxu0 %v976_v2  ;;  %704 = vmatmul.mubr.msk.f32.vlgmr.msra.gmra.mrb[0].mxu1 %vm417_vm3, %v303_v20  ;;  %v728_v34 = vpack.c.bf16 %v345_v33, %v344_v32  ;;  %v496_v45 = vld [vmem:[%s1227_s4] sm:$0xff]  ;;  %s882_s13 = scalar_lea.vmem %s1178_s26, 128  ;;  %p1242_p8 = scmp.ne.s32.totalorder %s1235_s28, 0 }
  0x59   : > { %p883_p13 = scmp.ne.s32.totalorder %s1178_s26, %s882_s13  ;;  %s983_s21 = smov [#allocation7]  }
  0x5a   : > { %822 = vset.pattern.permute.xlu0 %v977_v12  ;;  %824 = vset.pattern.permute.xlu1 %v978_v13  ;;  %s886_s9 = sshll.u32 %s983_s21, 4  ;;  %s887_s9 = int_to_ptr.vmem [resolvable:$false] %s886_s9 }
  0x5b   : > { %314 = vperm.xlu0 %822, %v306_v3   ;;  %324 = vperm.xlu1 %824, %v306_v3   ;;  %p884_p10 = pnand %p883_p13, %p1242_p8  ;;  %s888_s12 = scalar_lea.vmem %s887_s9, 256 }
  0x5c   : > { %714 = vmatpush3.bf16.msra.mxu0 %v713_v17  ;;  %p889_p2 = scmp.lt.s32.totalorder %s1178_s26, %s887_s9  ;;  %p890_p3 = scmp.lt.s32.totalorder %s888_s12, %s882_s13 }
  0x5d   : > { %715 = vmatprep.subr.bf16.mxu0 %v976_v2  ;;  %p885_p11 = pneg %p884_p10 }
  0x5e   : > { %p891_p5 = por %p890_p3, %p889_p2 }
  0x5f   : > { %825 = vset.pattern.permute.xlu0 %v978_v13 }
  0x60   : > { %717 = vmatpush3.bf16.msra.mxu0 %v716_v22  ;;  %p892_p6 = pnand %p891_p5, %p885_p11 }
  0x61   : > { %718 = vmatprep.subr.bf16.mxu0 %v976_v2 }
  0x64   : > { %720 = vmatpush3.bf16.msra.mxu0 %v719_v25 }
  0x65   : > { %721 = vmatprep.subr.bf16.mxu0 %v976_v2 }
  0x68   : > { %723 = vmatpush3.bf16.msra.mxu0 %v722_v28 }
  0x69   : > { %724 = vmatprep.subr.bf16.mxu0 %v976_v2 }
  0x6c   : > { %726 = vmatpush3.bf16.msra.mxu0 %v725_v31 }
  0x6d   : > { %727 = vmatprep.subr.bf16.mxu0 %v976_v2 }
  0x70   : > { %729 = vmatpush3.bf16.msra.mxu0 %v728_v34 }
  0xd5   : > { %v311_v36 = vpop.permute.xlu0 %310  ;;  %v320_v37 = vpop.permute.xlu1 %319 }
  0xd6   : > { %vm312_vm5 = vcmp.eq.s32.totalorder %v308_v38, %v311_v36  ;;  %vm321_vm8 = vcmp.eq.s32.totalorder %v308_v38, %v320_v37 }
  0xda   : > { %v315_v39 = vpop.permute.xlu0 %314  ;;  %v325_v40 = vpop.permute.xlu1 %324 }
  0xdb   : > { %vm316_vm6 = vcmp.eq.s32.totalorder %v308_v38, %v315_v39  ;;  %vm326_vm7 = vcmp.eq.s32.totalorder %v308_v38, %v325_v40 }
  0xdc   : > { %vm317_vm9 = vmor %vm312_vm5, %vm316_vm6 }
  0xdd   : > { %vm322_vm10 = vmor %vm317_vm9, %vm321_vm8 }
  0xde   : > { %vm327_vm11 = vmor %vm322_vm10, %vm326_vm7 }
  0xdf   : > { %697 = vmatmul.mubr.msk.f32.vlgmr.msra.gmra.mrb[0].mxu0 %vm327_vm11, %v982_v41 }
 0x12b   : > { %v491_v42 = vpop.f32.mrb[0].mxu1 }
 0x12c   : > { %v705_v43 = vpop.f32.mrb[1].mxu1 }
 0x1b2   : > { %v412_v44 = vpop.f32.mrb[0].mxu0 }
 0x1b3   : > { %v492_v46 = vadd.f32 %v491_v42, %v412_v44  ;;  %v698_v47 = vpop.f32.mrb[1].mxu0 }
 0x1b5   : > { %v497_v48 = vadd.f32 %v496_v45, %v492_v46 }
 0x1b7   : > { %498 = vst [vmem:[%s288_s10] sm:$0xff] %v497_v48 }
 0x1b8   : > { %895 = shalt.err (!%p892_p6)
}
 0x1b9   : > { %s896_s15 = scalar_lea.hbm %s1176_s11, 128  ;;  %s900_s24 = scalar_lea.hbm %s1228_s5, 256 }
 0x1ba   : > { %p897_p7 = scmp.ne.s32.totalorder %s1176_s11, %s896_s15  ;;  %p901_p0 = scmp.lt.u32.totalorder %s1176_s11, %s1228_s5 }
 0x1bb   : > { %p902_p4 = scmp.lt.u32.totalorder %s900_s24, %s896_s15  ;;  %p904_p13 = scmp.lt.u32.totalorder %s896_s15, %s1176_s11 }
 0x1bc   : > { %p898_p9 = pnand %p897_p7, %p1242_p8 }
 0x1bd   : > { %p903_p1 = por %p902_p4, %p901_p0 }
 0x1be   : > { %p899_p12 = pneg %p898_p9 }
 0x1bf   : > { %p905_p10 = por %p904_p13, %p903_p1 }
 0x1c1   : > { %p906_p11 = pnand %p905_p10, %p899_p12 }
 0x1c3   : > { %909 = shalt.err (!%p906_p11)
}
 0x1c4   : > { %742 = dma.vmem_to_hbm [thread:$0]  (%p1242_p8), %s1178_s26, 128, %s1176_s11, %s500_s8  }
 0x1c5 PF: > { %p759_p2 = scmp.ge.s32.totalorder %s968_s23, 2  ;;  %s526_s29 = sand.u32 1, %s948_s18  }
 0x1c6   : > { %p1243_p3 = scmp.ne.s32.totalorder %s1236_s30, 0  ;;  %s527_s10 = scalar_lea.sflag [#allocation4], %s526_s29 }
 0x1c8   : > { %p752_p5 = pnand %p759_p2, %p1243_p3 }
 0x1ca   : > { %943 = dma.done.wait (!%p752_p5), %s527_s10, 128  }
 0x1cb   : > { %945 = vsyncadd (!%p752_p5), %s527_s10, 4294967168  ;;  %s20_s23 = sadd.s32 1, %s968_s23   ;;  %s1244_s28 = sld [smem:[#allocation11_spill]] }
 0x1cc   : > { %p17_p6 = scmp.ge.s32.totalorder %s20_s23, 4   ;;  %s1245_s18 = smov %s952_s19 }
 0x1cd   : > { %s1246_s19 = smov %s956_s20  ;;  %s1247_s20 = smov %s1067_s6 }
 0x1ce   : > { %s1248_s21 = smov %s964_s22  ;;  %19 = sbr.rel (!%p17_p6) target bundleno = 6 (0x6), region = 88 }
 0x1d1   : > { %s1249_s22 = smov %s1244_s28 }
 0x1d5   :  { %532 = vsyncpa [#allocation3], 1 }
 0x1d6   :  { %534 = vsyncpa [#allocation3 + $0x1], 1 }
 0x1d7   :  { %535 = vsyncpa [#allocation6], 1 }
 0x1d8   :  { %536 = vsyncpa [#allocation4], 1 }
 0x1d9   :  { %538 = vsyncpa [#allocation4 + $0x1], 1 }

</bundles_post_ra>
